<compile_context>
chip_gen: v7x
topology: tpu7x:2x2x1
jax: 0.10.0
libtpu: 0.0.40
codegen_flags: <defaults>
</compile_context>

<pallas_src>
import functools

import jax
import jax.numpy as jnp
from jax.experimental import pallas as pl
from jax.experimental.pallas import tpu as pltpu

_SQRT_2_OVER_PI = 0.7978845608028654
_INV_SQRT_2 = 0.7071067811865476
_GELU_TANH_C = 0.044715


def _residual_kernel(x_ref, w_ref, p_ref, o_ref, xpad_ref, *, K, gelu):
    """One (batch, channel-block, row-block) tile per grid step (NHWC layout).

    x_ref    : (1, H, W, TC)     full-height input block (also the residual);
                                 h-invariant index_map -> fetched once per (n, c)
    w_ref    : (K*K, TC)         depthwise conv taps, [di*K + dj, c]
    p_ref    : (3, TC)           [conv_bias, bn_scale, bn_shift] (BN pre-folded)
    o_ref    : (1, BH, W, TC)    output row-block
    xpad_ref : (BH+2p, Wp, TC)   VMEM scratch: zero-padded row strip,
                                 Wp = round_up(W + 2p, 8)
    """
    _, H, W, TC = x_ref.shape
    BH = o_ref.shape[1]
    pad = K // 2
    Hs, Wp = xpad_ref.shape[0], xpad_ref.shape[1]

    h = pl.program_id(2)
    nh = pl.num_programs(2)
    row0 = pl.multiple_of(h * BH, BH)

    # ---- Build the zero-padded strip in VMEM (halo-only zeroing). ----
    if pad > 0:
        # Left / right column halos (right one also covers the 8-alignment pad).
        xpad_ref[:, 0:pad, :] = jnp.zeros((Hs, pad, TC), xpad_ref.dtype)
        xpad_ref[:, pad + W:, :] = jnp.zeros((Hs, Wp - pad - W, TC), xpad_ref.dtype)

    # Interior rows of this strip (strip-sized copy, interleaves with compute).
    xpad_ref[pad:pad + BH, pad:pad + W, :] = x_ref[0, pl.ds(row0, BH), :, :]

    if pad > 0:
        # Top halo rows: zero at the global top edge, else copy from the image.
        @pl.when(h == 0)
        def _():
            xpad_ref[0:pad, pad:pad + W, :] = jnp.zeros((pad, W, TC), xpad_ref.dtype)

        @pl.when(h > 0)
        def _():
            xpad_ref[0:pad, pad:pad + W, :] = x_ref[0, pl.ds(row0 - pad, pad), :, :]

        # Bottom halo rows.
        @pl.when(h == nh - 1)
        def _():
            xpad_ref[pad + BH:Hs, pad:pad + W, :] = jnp.zeros((pad, W, TC), xpad_ref.dtype)

        @pl.when(h < nh - 1)
        def _():
            xpad_ref[pad + BH:Hs, pad:pad + W, :] = x_ref[0, pl.ds(row0 + BH, pad), :, :]

    # ---- Hoisted per-channel parameters (loaded once per grid step). ----
    w_all = w_ref[...].astype(jnp.float32)                      # (K*K, TC)
    w_taps = [w_all[i][None, None, :] for i in range(K * K)]    # K*K x (1, 1, TC)
    bias = p_ref[0, :].astype(jnp.float32)[None, None, :]
    scale = p_ref[1, :].astype(jnp.float32)[None, None, :]
    shift = p_ref[2, :].astype(jnp.float32)[None, None, :]

    # ---- Depthwise cross-correlation (PyTorch conv semantics), f32 acc. ----
    acc = jnp.broadcast_to(bias, (BH, W, TC))                   # bias folded into init
    for di in range(K):
        strip = xpad_ref[di:di + BH, :, :]                      # (BH, Wp, TC), one load per di
        for dj in range(K):
            tap = strip[:, dj:dj + W, :].astype(jnp.float32)    # in-register column shift
            acc = acc + tap * w_taps[di * K + dj]

    # ---- GELU: default tanh-approx (EUP); exact erf path kept for parity. ----
    if gelu == "tanh":
        inner = jnp.float32(_SQRT_2_OVER_PI) * (
            acc + jnp.float32(_GELU_TANH_C) * acc * acc * acc)
        y = 0.5 * acc * (1.0 + jnp.tanh(inner))
    else:
        y = 0.5 * acc * (1.0 + jax.lax.erf(acc * jnp.float32(_INV_SQRT_2)))

    # ---- Folded eval-mode BatchNorm2d + residual add. ----
    y = y * scale + shift
    res = x_ref[0, pl.ds(row0, BH), :, :].astype(jnp.float32)
    o_ref[0, :, :, :] = (y + res).astype(o_ref.dtype)


def _round_up(x, m):
    return -(-x // m) * m


def _pick_rows_per_block(H, W, TC, pad, budget_bytes=32 * 1024):
    """Largest divisor of H (>= pad) whose f32 (BH, W, TC) accumulator fits budget."""
    cands = [d for d in range(1, H + 1) if H % d == 0 and d >= max(pad, 1)]
    fit = [d for d in cands if d * W * TC * 4 <= budget_bytes]
    # TODO(synk): also chunk over W for extreme W*TC where even BH == pad overflows.
    return max(fit) if fit else min(cands)


def _vmem_limit_bytes(step_bytes):
    cap = 64 * 2**20
    try:
        cap = int(getattr(pltpu.get_tpu_info(), "vmem_capacity_bytes", cap))
    except Exception:
        pass
    cap = (cap * 3) // 4  # headroom for Mosaic internal scratch (matters on v7x: 64 MiB/TC)
    return int(min(cap, max(32 * 2**20, 2 * step_bytes)))


def residual_convmixer_nhwc(x_nhwc, w_oihw, conv_bias, bn_gamma, bn_beta,
                            bn_mean, bn_var, *, kernel_size=3, eps=1e-5,
                            gelu="tanh"):
    """Transpose-free fast path: Residual(conv_dw -> GELU -> BN)(x), NHWC."""
    N, H, W, C = x_nhwc.shape
    k = kernel_size
    assert k % 2 == 1, "even kernel_size needs asymmetric 'same' padding"
    # TODO(synk): padding='same' for even kernel_size needs asymmetric padding.
    p = k // 2

    # (C, 1, k, k) -> (k*k, C) with [di*k+dj, c] = w[c, 0, di, dj]
    w_flat = jnp.transpose(w_oihw[:, 0, :, :].reshape(C, k * k), (1, 0))
    w_flat = w_flat.astype(jnp.float32)

    # Fold eval-mode BatchNorm into a single per-channel scale/shift.
    scale = bn_gamma.astype(jnp.float32) * jax.lax.rsqrt(
        bn_var.astype(jnp.float32) + jnp.float32(eps))
    shift = bn_beta.astype(jnp.float32) - bn_mean.astype(jnp.float32) * scale
    params = jnp.stack([conv_bias.astype(jnp.float32), scale, shift], axis=0)

    # Channel blocking (lane axis stays dense); row blocking bounds the f32 acc.
    TC = 128 if (C % 128 == 0 and C > 128) else C
    NC = C // TC
    BH = _pick_rows_per_block(H, W, TC, p)
    NH = H // BH
    Hs = BH + 2 * p
    Wp = _round_up(W + 2 * p, 8)

    isz = jnp.dtype(x_nhwc.dtype).itemsize
    step_bytes = (2 * H * W * TC * isz          # input block (double-buffered)
                  + 2 * BH * W * TC * isz       # output block (double-buffered)
                  + Hs * Wp * TC * isz          # padded VMEM scratch
                  + 2 * (k * k + 3) * TC * 4)   # taps + folded BN params
    vmem_limit = _vmem_limit_bytes(step_bytes)

    return pl.pallas_call(
        functools.partial(_residual_kernel, K=k, gelu=gelu),
        out_shape=jax.ShapeDtypeStruct((N, H, W, C), x_nhwc.dtype),
        grid_spec=pltpu.PrefetchScalarGridSpec(
            num_scalar_prefetch=0,
            grid=(N, NC, NH),
            in_specs=[
                # Full-height input block, invariant over the h axis.
                pl.BlockSpec((1, H, W, TC), lambda n, c, h: (n, 0, 0, c)),
                pl.BlockSpec((k * k, TC), lambda n, c, h: (0, c)),
                pl.BlockSpec((3, TC), lambda n, c, h: (0, c)),
            ],
            out_specs=pl.BlockSpec((1, BH, W, TC), lambda n, c, h: (n, h, 0, c)),
            scratch_shapes=[pltpu.VMEM((Hs, Wp, TC), x_nhwc.dtype)],
        ),
        compiler_params=pltpu.CompilerParams(
            dimension_semantics=("parallel", "parallel", "parallel"),
            vmem_limit_bytes=vmem_limit),
    )(x_nhwc, w_flat, params)


def residual_convmixer(x_nchw, w_oihw, conv_bias, bn_gamma, bn_beta,
                       bn_mean, bn_var, *, kernel_size=3, gelu="tanh"):
    """NCHW compatibility wrapper (PyTorch layout).  Prefer the NHWC path."""
    x = jnp.transpose(x_nchw, (0, 2, 3, 1))
    out = residual_convmixer_nhwc(x, w_oihw, conv_bias, bn_gamma, bn_beta,
                                  bn_mean, bn_var, kernel_size=kernel_size,
                                  gelu=gelu)
    return jnp.transpose(out, (0, 3, 1, 2))


def _reference_nchw(x, w, b, gamma, beta, mean, var, *, gelu="erf", eps=1e-5):
    """Pure-JAX reference (XLA conv) for correctness checking, NCHW."""
    C = x.shape[1]
    y = jax.lax.conv_general_dilated(
        x, w, window_strides=(1, 1), padding="SAME",
        feature_group_count=C,
        dimension_numbers=("NCHW", "OIHW", "NCHW"))
    y = y + b[None, :, None, None]
    if gelu == "tanh":
        y = 0.5 * y * (1.0 + jnp.tanh(_SQRT_2_OVER_PI * (y + _GELU_TANH_C * y ** 3)))
    else:
        y = 0.5 * y * (1.0 + jax.lax.erf(y * _INV_SQRT_2))
    y = ((y - mean[None, :, None, None])
         * jax.lax.rsqrt(var[None, :, None, None] + eps)
         * gamma[None, :, None, None]
         + beta[None, :, None, None])
    return y + x


if __name__ == "__main__":
    # Small, deterministic shapes; C=128 keeps the channel (lane) axis dense,
    # consistent with real ConvMixer widths.
    N, C, H, W = 2, 128, 16, 16
    K = 3

    key = jax.random.PRNGKey(0)
    kx, kw, kb, kg, kbt, km, kv = jax.random.split(key, 7)

    x_nchw = jax.random.normal(kx, (N, C, H, W), dtype=jnp.float32)
    # Depthwise conv weights (out=C, in/groups=1, kH, kW), like nn.Conv2d(groups=C).
    w = jax.random.normal(kw, (C, 1, K, K), dtype=jnp.float32) * 0.1
    conv_bias = jax.random.normal(kb, (C,), dtype=jnp.float32) * 0.1
    bn_gamma = 1.0 + 0.1 * jax.random.normal(kg, (C,), dtype=jnp.float32)
    bn_beta = 0.1 * jax.random.normal(kbt, (C,), dtype=jnp.float32)
    bn_mean = 0.1 * jax.random.normal(km, (C,), dtype=jnp.float32)
    bn_var = jnp.abs(jax.random.normal(kv, (C,), dtype=jnp.float32)) + 0.5

    x_nhwc = jnp.transpose(x_nchw, (0, 2, 3, 1))

    # 1) Parity path: exact erf GELU (torch.nn.GELU() default), f32.
    ref_erf = _reference_nchw(x_nchw, w, conv_bias, bn_gamma, bn_beta,
                              bn_mean, bn_var, gelu="erf")
    ref_erf_nhwc = jnp.transpose(ref_erf, (0, 2, 3, 1))
    out_erf = jax.block_until_ready(
        residual_convmixer_nhwc(x_nhwc, w, conv_bias, bn_gamma, bn_beta,
                                bn_mean, bn_var, kernel_size=K, gelu="erf"))
    assert out_erf.shape == (N, H, W, C)
    assert jnp.allclose(out_erf, ref_erf_nhwc, atol=1e-4, rtol=1e-4), "erf NHWC mismatch"

    # 2) Fast path: tanh-approximate GELU on the EUP (default).
    ref_tanh = _reference_nchw(x_nchw, w, conv_bias, bn_gamma, bn_beta,
                               bn_mean, bn_var, gelu="tanh")
    ref_tanh_nhwc = jnp.transpose(ref_tanh, (0, 2, 3, 1))
    out_tanh = jax.block_until_ready(
        residual_convmixer_nhwc(x_nhwc, w, conv_bias, bn_gamma, bn_beta,
                                bn_mean, bn_var, kernel_size=K, gelu="tanh"))
    assert jnp.allclose(out_tanh, ref_tanh_nhwc, atol=5e-4, rtol=5e-4), "tanh NHWC mismatch"

    # 3) bf16 activations end-to-end (halved HBM/VMEM traffic, f32 accumulation).
    x_bf16 = x_nhwc.astype(jnp.bfloat16)
    out_bf16 = jax.block_until_ready(
        residual_convmixer_nhwc(x_bf16, w, conv_bias, bn_gamma, bn_beta,
                                bn_mean, bn_var, kernel_size=K, gelu="tanh"))
    assert out_bf16.dtype == jnp.bfloat16
    ref_bf16 = _reference_nchw(
        jnp.transpose(x_bf16.astype(jnp.float32), (0, 3, 1, 2)),
        w, conv_bias, bn_gamma, bn_beta, bn_mean, bn_var, gelu="tanh")
    ref_bf16_nhwc = jnp.transpose(ref_bf16, (0, 2, 3, 1))
    assert jnp.allclose(out_bf16.astype(jnp.float32), ref_bf16_nhwc,
                        atol=5e-2, rtol=5e-2), "bf16 NHWC mismatch"

    # 4) PyTorch-layout (NCHW) compatibility wrapper — same forward semantics.
    out_nchw = jax.block_until_ready(
        residual_convmixer(x_nchw, w, conv_bias, bn_gamma, bn_beta,
                           bn_mean, bn_var, kernel_size=K, gelu="erf"))
    assert out_nchw.shape == (N, C, H, W)
    assert jnp.allclose(out_nchw, ref_erf, atol=1e-4, rtol=1e-4), "NCHW mismatch"

    print("KERNEL_OK")
</pallas_src>

<mosaic_0001>
module attributes {stable_mosaic.version = 11 : i64} {
  func.func @_residual_kernel(%arg0: i32, %arg1: i32, %arg2: i32, %arg3: memref<1x16x16x128xf32, #tpu.memory_space<vmem>>, %arg4: memref<9x128xf32, #tpu.memory_space<vmem>>, %arg5: memref<3x128xf32, #tpu.memory_space<vmem>>, %arg6: memref<1x4x16x128xf32, #tpu.memory_space<vmem>>, %arg7: memref<6x24x128xf32, #tpu.memory_space<vmem>>) attributes {dimension_semantics = [#tpu.dimension_semantics<parallel>, #tpu.dimension_semantics<parallel>, #tpu.dimension_semantics<parallel>], iteration_bounds = array<i64: 2, 1, 4>, scalar_prefetch = 0 : i64, scratch_operands = 1 : i64, tpu.core_type = #tpu.core_type<tc>, window_params = [{transform_indices = @transform_0, window_bounds = array<i64: 1, 16, 16, 128>}, {transform_indices = @transform_1, window_bounds = array<i64: 9, 128>}, {transform_indices = @transform_2, window_bounds = array<i64: 3, 128>}, {transform_indices = @transform_3, window_bounds = array<i64: 1, 4, 16, 128>}]} {
    %c4_i32 = arith.constant 4 : i32
    %0 = arith.muli %arg2, %c4_i32 : i32
    %1 = tpu.assume_multiple %0, 4 : i32
    %cst = arith.constant 0.000000e+00 : f32
    %2 = vector.broadcast %cst : f32 to vector<6x1x128xf32>
    %c0 = arith.constant 0 : index
    %c0_0 = arith.constant 0 : index
    %c0_1 = arith.constant 0 : index
    %3 = vector.load %arg7[%c0, %c0_0, %c0_1] : memref<6x24x128xf32, #tpu.memory_space<vmem>>, vector<6x1x128xf32>
    tpu.vector_store %arg7[%c0, %c0_0, %c0_1], %2 {strides = array<i32>} : memref<6x24x128xf32, #tpu.memory_space<vmem>>, vector<6x1x128xf32>,
    %cst_2 = arith.constant 0.000000e+00 : f32
    %4 = vector.broadcast %cst_2 : f32 to vector<6x7x128xf32>
    %c0_3 = arith.constant 0 : index
    %c17 = arith.constant 17 : index
    %c0_4 = arith.constant 0 : index
    %5 = vector.load %arg7[%c0_3, %c17, %c0_4] : memref<6x24x128xf32, #tpu.memory_space<vmem>>, vector<6x7x128xf32>
    tpu.vector_store %arg7[%c0_3, %c17, %c0_4], %4 {strides = array<i32>} : memref<6x24x128xf32, #tpu.memory_space<vmem>>, vector<6x7x128xf32>,
    %c0_5 = arith.constant 0 : index
    %6 = arith.index_cast %1 : i32 to index
    %c0_6 = arith.constant 0 : index
    %c0_7 = arith.constant 0 : index
    %7 = vector.load %arg3[%c0_5, %6, %c0_6, %c0_7] : memref<1x16x16x128xf32, #tpu.memory_space<vmem>>, vector<1x4x16x128xf32>
    %8 = vector.shape_cast %7 : vector<1x4x16x128xf32> to vector<4x16x128xf32>
    %c1 = arith.constant 1 : index
    %c1_8 = arith.constant 1 : index
    %c0_9 = arith.constant 0 : index
    %9 = vector.load %arg7[%c1, %c1_8, %c0_9] : memref<6x24x128xf32, #tpu.memory_space<vmem>>, vector<4x16x128xf32>
    tpu.vector_store %arg7[%c1, %c1_8, %c0_9], %8 {strides = array<i32>} : memref<6x24x128xf32, #tpu.memory_space<vmem>>, vector<4x16x128xf32>,
    %c0_i32 = arith.constant 0 : i32
    %10 = arith.cmpi eq, %arg2, %c0_i32 : i32
    %11 = arith.extui %10 : i1 to i32
    %c0_i32_10 = arith.constant 0 : i32
    %12 = arith.cmpi ne, %11, %c0_i32_10 : i32
    scf.if %12 {
      %cst_42 = arith.constant 0.000000e+00 : f32
      %119 = vector.broadcast %cst_42 : f32 to vector<1x16x128xf32>
      %c0_43 = arith.constant 0 : index
      %c1_44 = arith.constant 1 : index
      %c0_45 = arith.constant 0 : index
      %120 = vector.load %arg7[%c0_43, %c1_44, %c0_45] : memref<6x24x128xf32, #tpu.memory_space<vmem>>, vector<1x16x128xf32>
      tpu.vector_store %arg7[%c0_43, %c1_44, %c0_45], %119 {strides = array<i32>} : memref<6x24x128xf32, #tpu.memory_space<vmem>>, vector<1x16x128xf32>,
    } else {
    }
    %c0_i32_11 = arith.constant 0 : i32
    %13 = arith.cmpi sgt, %arg2, %c0_i32_11 : i32
    %14 = arith.extui %13 : i1 to i32
    %c0_i32_12 = arith.constant 0 : i32
    %15 = arith.cmpi ne, %14, %c0_i32_12 : i32
    scf.if %15 {
      %c1_i32 = arith.constant 1 : i32
      %119 = arith.subi %1, %c1_i32 : i32
      %c0_42 = arith.constant 0 : index
      %120 = arith.index_cast %119 : i32 to index
      %c0_43 = arith.constant 0 : index
      %c0_44 = arith.constant 0 : index
      %121 = vector.load %arg3[%c0_42, %120, %c0_43, %c0_44] : memref<1x16x16x128xf32, #tpu.memory_space<vmem>>, vector<1x1x16x128xf32>
      %122 = vector.shape_cast %121 : vector<1x1x16x128xf32> to vector<1x16x128xf32>
      %c0_45 = arith.constant 0 : index
      %c1_46 = arith.constant 1 : index
      %c0_47 = arith.constant 0 : index
      %123 = vector.load %arg7[%c0_45, %c1_46, %c0_47] : memref<6x24x128xf32, #tpu.memory_space<vmem>>, vector<1x16x128xf32>
      tpu.vector_store %arg7[%c0_45, %c1_46, %c0_47], %122 {strides = array<i32>} : memref<6x24x128xf32, #tpu.memory_space<vmem>>, vector<1x16x128xf32>,
    } else {
    }
    %c3_i32 = arith.constant 3 : i32
    %16 = arith.cmpi eq, %arg2, %c3_i32 : i32
    %17 = arith.extui %16 : i1 to i32
    %c0_i32_13 = arith.constant 0 : i32
    %18 = arith.cmpi ne, %17, %c0_i32_13 : i32
    scf.if %18 {
      %cst_42 = arith.constant 0.000000e+00 : f32
      %119 = vector.broadcast %cst_42 : f32 to vector<1x16x128xf32>
      %c5 = arith.constant 5 : index
      %c1_43 = arith.constant 1 : index
      %c0_44 = arith.constant 0 : index
      %120 = vector.load %arg7[%c5, %c1_43, %c0_44] : memref<6x24x128xf32, #tpu.memory_space<vmem>>, vector<1x16x128xf32>
      tpu.vector_store %arg7[%c5, %c1_43, %c0_44], %119 {strides = array<i32>} : memref<6x24x128xf32, #tpu.memory_space<vmem>>, vector<1x16x128xf32>,
    } else {
    }
    %c3_i32_14 = arith.constant 3 : i32
    %19 = arith.cmpi slt, %arg2, %c3_i32_14 : i32
    %20 = arith.extui %19 : i1 to i32
    %c0_i32_15 = arith.constant 0 : i32
    %21 = arith.cmpi ne, %20, %c0_i32_15 : i32
    scf.if %21 {
      %c4_i32_42 = arith.constant 4 : i32
      %119 = arith.addi %1, %c4_i32_42 : i32
      %c0_43 = arith.constant 0 : index
      %120 = arith.index_cast %119 : i32 to index
      %c0_44 = arith.constant 0 : index
      %c0_45 = arith.constant 0 : index
      %121 = vector.load %arg3[%c0_43, %120, %c0_44, %c0_45] : memref<1x16x16x128xf32, #tpu.memory_space<vmem>>, vector<1x1x16x128xf32>
      %122 = vector.shape_cast %121 : vector<1x1x16x128xf32> to vector<1x16x128xf32>
      %c5 = arith.constant 5 : index
      %c1_46 = arith.constant 1 : index
      %c0_47 = arith.constant 0 : index
      %123 = vector.load %arg7[%c5, %c1_46, %c0_47] : memref<6x24x128xf32, #tpu.memory_space<vmem>>, vector<1x16x128xf32>
      tpu.vector_store %arg7[%c5, %c1_46, %c0_47], %122 {strides = array<i32>} : memref<6x24x128xf32, #tpu.memory_space<vmem>>, vector<1x16x128xf32>,
    } else {
    }
    %c0_16 = arith.constant 0 : index
    %c0_17 = arith.constant 0 : index
    %22 = vector.load %arg4[%c0_16, %c0_17] : memref<9x128xf32, #tpu.memory_space<vmem>>, vector<9x128xf32>
    %23 = vector.extract_strided_slice %22 {offsets = [0, 0], sizes = [1, 128], strides = [1, 1]} : vector<9x128xf32> to vector<1x128xf32>
    %24 = vector.shape_cast %23 : vector<1x128xf32> to vector<128xf32>
    %25 = vector.shape_cast %24 : vector<128xf32> to vector<1x1x128xf32>
    %26 = vector.extract_strided_slice %22 {offsets = [1, 0], sizes = [1, 128], strides = [1, 1]} : vector<9x128xf32> to vector<1x128xf32>
    %27 = vector.shape_cast %26 : vector<1x128xf32> to vector<128xf32>
    %28 = vector.shape_cast %27 : vector<128xf32> to vector<1x1x128xf32>
    %29 = vector.extract_strided_slice %22 {offsets = [2, 0], sizes = [1, 128], strides = [1, 1]} : vector<9x128xf32> to vector<1x128xf32>
    %30 = vector.shape_cast %29 : vector<1x128xf32> to vector<128xf32>
    %31 = vector.shape_cast %30 : vector<128xf32> to vector<1x1x128xf32>
    %32 = vector.extract_strided_slice %22 {offsets = [3, 0], sizes = [1, 128], strides = [1, 1]} : vector<9x128xf32> to vector<1x128xf32>
    %33 = vector.shape_cast %32 : vector<1x128xf32> to vector<128xf32>
    %34 = vector.shape_cast %33 : vector<128xf32> to vector<1x1x128xf32>
    %35 = vector.extract_strided_slice %22 {offsets = [4, 0], sizes = [1, 128], strides = [1, 1]} : vector<9x128xf32> to vector<1x128xf32>
    %36 = vector.shape_cast %35 : vector<1x128xf32> to vector<128xf32>
    %37 = vector.shape_cast %36 : vector<128xf32> to vector<1x1x128xf32>
    %38 = vector.extract_strided_slice %22 {offsets = [5, 0], sizes = [1, 128], strides = [1, 1]} : vector<9x128xf32> to vector<1x128xf32>
    %39 = vector.shape_cast %38 : vector<1x128xf32> to vector<128xf32>
    %40 = vector.shape_cast %39 : vector<128xf32> to vector<1x1x128xf32>
    %41 = vector.extract_strided_slice %22 {offsets = [6, 0], sizes = [1, 128], strides = [1, 1]} : vector<9x128xf32> to vector<1x128xf32>
    %42 = vector.shape_cast %41 : vector<1x128xf32> to vector<128xf32>
    %43 = vector.shape_cast %42 : vector<128xf32> to vector<1x1x128xf32>
    %44 = vector.extract_strided_slice %22 {offsets = [7, 0], sizes = [1, 128], strides = [1, 1]} : vector<9x128xf32> to vector<1x128xf32>
    %45 = vector.shape_cast %44 : vector<1x128xf32> to vector<128xf32>
    %46 = vector.shape_cast %45 : vector<128xf32> to vector<1x1x128xf32>
    %47 = vector.extract_strided_slice %22 {offsets = [8, 0], sizes = [1, 128], strides = [1, 1]} : vector<9x128xf32> to vector<1x128xf32>
    %48 = vector.shape_cast %47 : vector<1x128xf32> to vector<128xf32>
    %49 = vector.shape_cast %48 : vector<128xf32> to vector<1x1x128xf32>
    %c0_18 = arith.constant 0 : index
    %c0_19 = arith.constant 0 : index
    %50 = vector.load %arg5[%c0_18, %c0_19] : memref<3x128xf32, #tpu.memory_space<vmem>>, vector<1x128xf32>
    %51 = vector.shape_cast %50 : vector<1x128xf32> to vector<128xf32>
    %52 = vector.shape_cast %51 : vector<128xf32> to vector<1x1x128xf32>
    %c1_20 = arith.constant 1 : index
    %c0_21 = arith.constant 0 : index
    %53 = vector.load %arg5[%c1_20, %c0_21] : memref<3x128xf32, #tpu.memory_space<vmem>>, vector<1x128xf32>
    %54 = vector.shape_cast %53 : vector<1x128xf32> to vector<128xf32>
    %55 = vector.shape_cast %54 : vector<128xf32> to vector<1x1x128xf32>
    %c2 = arith.constant 2 : index
    %c0_22 = arith.constant 0 : index
    %56 = vector.load %arg5[%c2, %c0_22] : memref<3x128xf32, #tpu.memory_space<vmem>>, vector<1x128xf32>
    %57 = vector.shape_cast %56 : vector<1x128xf32> to vector<128xf32>
    %58 = vector.shape_cast %57 : vector<128xf32> to vector<1x1x128xf32>
    %59 = vector.shape_cast %52 : vector<1x1x128xf32> to vector<1x1x128xf32>
    %60 = vector.broadcast %59 : vector<1x1x128xf32> to vector<4x16x128xf32>
    %c0_23 = arith.constant 0 : index
    %c0_24 = arith.constant 0 : index
    %c0_25 = arith.constant 0 : index
    %61 = vector.load %arg7[%c0_23, %c0_24, %c0_25] : memref<6x24x128xf32, #tpu.memory_space<vmem>>, vector<4x24x128xf32>
    %62 = vector.extract_strided_slice %61 {offsets = [0, 0, 0], sizes = [4, 16, 128], strides = [1, 1, 1]} : vector<4x24x128xf32> to vector<4x16x128xf32>
    %63 = vector.broadcast %25 : vector<1x1x128xf32> to vector<4x16x128xf32>
    %64 = arith.mulf %62, %63 : vector<4x16x128xf32>
    %65 = arith.addf %60, %64 : vector<4x16x128xf32>
    %66 = vector.extract_strided_slice %61 {offsets = [0, 1, 0], sizes = [4, 16, 128], strides = [1, 1, 1]} : vector<4x24x128xf32> to vector<4x16x128xf32>
    %67 = vector.broadcast %28 : vector<1x1x128xf32> to vector<4x16x128xf32>
    %68 = arith.mulf %66, %67 : vector<4x16x128xf32>
    %69 = arith.addf %65, %68 : vector<4x16x128xf32>
    %70 = vector.extract_strided_slice %61 {offsets = [0, 2, 0], sizes = [4, 16, 128], strides = [1, 1, 1]} : vector<4x24x128xf32> to vector<4x16x128xf32>
    %71 = vector.broadcast %31 : vector<1x1x128xf32> to vector<4x16x128xf32>
    %72 = arith.mulf %70, %71 : vector<4x16x128xf32>
    %73 = arith.addf %69, %72 : vector<4x16x128xf32>
    %c1_26 = arith.constant 1 : index
    %c0_27 = arith.constant 0 : index
    %c0_28 = arith.constant 0 : index
    %74 = vector.load %arg7[%c1_26, %c0_27, %c0_28] : memref<6x24x128xf32, #tpu.memory_space<vmem>>, vector<4x24x128xf32>
    %75 = vector.extract_strided_slice %74 {offsets = [0, 0, 0], sizes = [4, 16, 128], strides = [1, 1, 1]} : vector<4x24x128xf32> to vector<4x16x128xf32>
    %76 = vector.broadcast %34 : vector<1x1x128xf32> to vector<4x16x128xf32>
    %77 = arith.mulf %75, %76 : vector<4x16x128xf32>
    %78 = arith.addf %73, %77 : vector<4x16x128xf32>
    %79 = vector.extract_strided_slice %74 {offsets = [0, 1, 0], sizes = [4, 16, 128], strides = [1, 1, 1]} : vector<4x24x128xf32> to vector<4x16x128xf32>
    %80 = vector.broadcast %37 : vector<1x1x128xf32> to vector<4x16x128xf32>
    %81 = arith.mulf %79, %80 : vector<4x16x128xf32>
    %82 = arith.addf %78, %81 : vector<4x16x128xf32>
    %83 = vector.extract_strided_slice %74 {offsets = [0, 2, 0], sizes = [4, 16, 128], strides = [1, 1, 1]} : vector<4x24x128xf32> to vector<4x16x128xf32>
    %84 = vector.broadcast %40 : vector<1x1x128xf32> to vector<4x16x128xf32>
    %85 = arith.mulf %83, %84 : vector<4x16x128xf32>
    %86 = arith.addf %82, %85 : vector<4x16x128xf32>
    %c2_29 = arith.constant 2 : index
    %c0_30 = arith.constant 0 : index
    %c0_31 = arith.constant 0 : index
    %87 = vector.load %arg7[%c2_29, %c0_30, %c0_31] : memref<6x24x128xf32, #tpu.memory_space<vmem>>, vector<4x24x128xf32>
    %88 = vector.extract_strided_slice %87 {offsets = [0, 0, 0], sizes = [4, 16, 128], strides = [1, 1, 1]} : vector<4x24x128xf32> to vector<4x16x128xf32>
    %89 = vector.broadcast %43 : vector<1x1x128xf32> to vector<4x16x128xf32>
    %90 = arith.mulf %88, %89 : vector<4x16x128xf32>
    %91 = arith.addf %86, %90 : vector<4x16x128xf32>
    %92 = vector.extract_strided_slice %87 {offsets = [0, 1, 0], sizes = [4, 16, 128], strides = [1, 1, 1]} : vector<4x24x128xf32> to vector<4x16x128xf32>
    %93 = vector.broadcast %46 : vector<1x1x128xf32> to vector<4x16x128xf32>
    %94 = arith.mulf %92, %93 : vector<4x16x128xf32>
    %95 = arith.addf %91, %94 : vector<4x16x128xf32>
    %96 = vector.extract_strided_slice %87 {offsets = [0, 2, 0], sizes = [4, 16, 128], strides = [1, 1, 1]} : vector<4x24x128xf32> to vector<4x16x128xf32>
    %97 = vector.broadcast %49 : vector<1x1x128xf32> to vector<4x16x128xf32>
    %98 = arith.mulf %96, %97 : vector<4x16x128xf32>
    %99 = arith.addf %95, %98 : vector<4x16x128xf32>
    %cst_32 = arith.constant 5.000000e-01 : f32
    %100 = vector.broadcast %cst_32 : f32 to vector<4x16x128xf32>
    %101 = arith.mulf %100, %99 : vector<4x16x128xf32>
    %cst_33 = arith.constant 0.707106769 : f32
    %102 = vector.broadcast %cst_33 : f32 to vector<4x16x128xf32>
    %103 = arith.mulf %99, %102 : vector<4x16x128xf32>
    %104 = math.erf %103 : vector<4x16x128xf32>
    %cst_34 = arith.constant 1.000000e+00 : f32
    %105 = vector.broadcast %cst_34 : f32 to vector<4x16x128xf32>
    %106 = arith.addf %105, %104 : vector<4x16x128xf32>
    %107 = arith.mulf %101, %106 : vector<4x16x128xf32>
    %108 = vector.broadcast %55 : vector<1x1x128xf32> to vector<4x16x128xf32>
    %109 = arith.mulf %107, %108 : vector<4x16x128xf32>
    %110 = vector.broadcast %58 : vector<1x1x128xf32> to vector<4x16x128xf32>
    %111 = arith.addf %109, %110 : vector<4x16x128xf32>
    %c0_35 = arith.constant 0 : index
    %112 = arith.index_cast %1 : i32 to index
    %c0_36 = arith.constant 0 : index
    %c0_37 = arith.constant 0 : index
    %113 = vector.load %arg3[%c0_35, %112, %c0_36, %c0_37] : memref<1x16x16x128xf32, #tpu.memory_space<vmem>>, vector<1x4x16x128xf32>
    %114 = vector.shape_cast %113 : vector<1x4x16x128xf32> to vector<4x16x128xf32>
    %115 = arith.addf %111, %114 : vector<4x16x128xf32>
    %c0_38 = arith.constant 0 : index
    %c0_39 = arith.constant 0 : index
    %c0_40 = arith.constant 0 : index
    %c0_41 = arith.constant 0 : index
    %116 = vector.load %arg6[%c0_38, %c0_39, %c0_40, %c0_41] : memref<1x4x16x128xf32, #tpu.memory_space<vmem>>, vector<1x4x16x128xf32>
    %117 = vector.shape_cast %116 : vector<1x4x16x128xf32> to vector<4x16x128xf32>
    %118 = vector.shape_cast %115 : vector<4x16x128xf32> to vector<1x4x16x128xf32>
    tpu.vector_store %arg6[%c0_38, %c0_39, %c0_40, %c0_41], %118 {strides = array<i32>} : memref<1x4x16x128xf32, #tpu.memory_space<vmem>>, vector<1x4x16x128xf32>,
    return
  }
  func.func @transform_0(%arg0: i32, %arg1: i32, %arg2: i32) -> (i32, i32, i32, i32) {
    %c0_i32 = arith.constant 0 : i32
    %c0_i32_0 = arith.constant 0 : i32
    %c0_i32_1 = arith.constant 0 : i32
    return %arg0, %c0_i32, %c0_i32_0, %arg1 : i32, i32, i32, i32
  }
  func.func @transform_1(%arg0: i32, %arg1: i32, %arg2: i32) -> (i32, i32) {
    %c0_i32 = arith.constant 0 : i32
    %c0_i32_0 = arith.constant 0 : i32
    return %c0_i32, %arg1 : i32, i32
  }
  func.func @transform_2(%arg0: i32, %arg1: i32, %arg2: i32) -> (i32, i32) {
    %c0_i32 = arith.constant 0 : i32
    %c0_i32_0 = arith.constant 0 : i32
    return %c0_i32, %arg1 : i32, i32
  }
  func.func @transform_3(%arg0: i32, %arg1: i32, %arg2: i32) -> (i32, i32, i32, i32) {
    %c0_i32 = arith.constant 0 : i32
    %c0_i32_0 = arith.constant 0 : i32
    return %arg0, %arg2, %c0_i32, %arg1 : i32, i32, i32, i32
  }
}

</mosaic_0001>

<bundles_post_ra>
// kernel: tpu_custom_call.1
= control target key start
LH: loop header
LB: loop body
LE: loop exit
PB: predicated region body
PF: predicated region fallthrough
CT: control target
= control target key end

     0   :  { %s2149_s0 = inlined_call_operand.hbm [shape: f32[2,16,16,128], index: 0, kind: input, shape index: {}]   ;;  %s2150_s1 = inlined_call_operand.hbm [shape: f32[9,128], index: 1, kind: input, shape index: {}]   ;;  %s2151_s2 = inlined_call_operand.vmem [shape: f32[3,128], index: 2, kind: input, shape index: {}]   ;;  %s2152_s3 = inlined_call_operand.hbm [shape: f32[2,16,16,128], index: 3, kind: output, shape index: {}]  }
   0x1   :  { %2165 = sst [smem:[#allocation17_spill]] %s2150_s1 }
   0x2   :  { %8 = vsyncpa [#allocation4], 0 }
   0x3   :  { %10 = vsyncpa [#allocation4 + $0x1], 0 }
   0x4   :  { %11 = vsyncpa [#allocation7], 0 }
   0x5   :  { %12 = vsyncpa [#allocation5], 0 }
   0x6   :  { %14 = vsyncpa [#allocation5 + $0x1], 0  ;;  %s1441_s12 = smov 0   ;;  %s1443_s13 = smov 0  }
   0x7   :  { %s1445_s14 = smov 0   ;;  %s1447_s15 = smov 0  }
   0x8   :  { %s1449_s16 = smov 0   ;;  %s1451_s17 = smov 0  }
   0x9   :  { %s1453_s18 = smov 0   ;;  %s1455_s19 = smov 0  }
   0xa   :  { %s1457_s20 = smov 0   ;;  %s1459_s21 = smov 0  }
   0xb   :  { %s1461_s22 = smov 0  }
   0xc LB: > { %2166 = sst [smem:[#allocation12_spill]] %s1369_s12  ;;  %s1049_s23 = sadd.s32 4294967295, %s1409_s22   ;;  %s1409_s22 = sphi %s1461_s22, %s20_s22   ;;  %s1405_s21 = sphi %s1459_s21, %s2199_s21   ;;  %s1401_s20 = sphi %s1457_s20, %s2190_s20   ;;  %s1397_s19 = sphi %s1455_s19, %s2198_s19   ;;  %s1393_s18 = sphi %s1453_s18, %s2189_s18   ;;  %s1389_s17 = sphi %s1451_s17, %s2197_s17   ;;  %s1385_s16 = sphi %s1449_s16, %s2196_s16   ;;  %s1381_s15 = sphi %s1447_s15, %s2195_s15   ;;  %s1377_s14 = sphi %s1445_s14, %s2194_s14   ;;  %s1373_s13 = sphi %s1443_s13, %s2193_s13   ;;  %s1369_s12 = sphi %s1441_s12, %s2192_s12  }
   0xd   : > { %2167 = sst [smem:[#allocation13_spill]] %s1401_s20  ;;  %s1050_s24 = sadd.s32 4294967294, %s1409_s22  }
   0xe   : > { %p61_p0 = scmp.ne.s32.totalorder %s1385_s16, %s1381_s15  ;;  %p1497_p1 = scmp.eq.s32.totalorder %s1049_s23, 0 }
   0xf   : > { %s130_s26 = sadd.s32 1, %s1377_s14  ;;  %p140_p2 = scmp.ne.s32.totalorder %s1377_s14, %s1373_s13 }
  0x10   : > { %s2168_s25 = scalar_select %p1497_p1, 1, 0 }
  0x11   : > { %p1506_p3 = por %p1497_p1, %p61_p0  ;;  %p141_p4 = scmp.eq.s32.totalorder %s1049_s23, 7 }
  0x12   : > { %p146_p5 = scmp.ne.s32.totalorder %s1373_s13, %s1369_s12  ;;  %p147_p6 = scmp.eq.s32.totalorder %s1050_s24, 7 }
  0x13   : > { %s2169_s27 = scalar_select %p1506_p3, 1, 0 }
  0x14   : > { %p1512_p7 = por %p141_p4, %p140_p2  ;;  %p1051_p8 = scmp.ge.s32.totalorder %s1409_s22, 1 }
  0x15   : > { %p1517_p9 = por %p147_p6, %p146_p5  ;;  %p154_p10 = scmp.lt.s32.totalorder %s1409_s22, 9 }
  0x16   : > { %s2170_s28 = scalar_select %p1512_p7, 1, 0 }
  0x17   : > { %s2171_s29 = scalar_select %p1517_p9, 1, 0 }
  0x18   : > { %p1522_p11 = pnand %p1051_p8, %p154_p10  ;;  %s1411_s4 = smov [#allocation6]  }
  0x19   : > { %2172 = sst [smem:[#allocation14_spill]] %s2171_s29  ;;  %s168_s5 = sshll.u32 %s1411_s4, 4  ;;  %s169_s5 = int_to_ptr.vmem [resolvable:$true] %s168_s5 }
  0x1a   : > { %s2173_s30 = scalar_select %p1522_p11, 1, 0 }
  0x1b   : > { %p1097_p12 = pneg %p1522_p11  ;;  %s2175_s1 = sld [smem:[#allocation17_spill]] }
  0x1d   : > { %p1530_p13 = pnand %p1097_p12, %p1497_p1 }
  0x1f   : > { %p1227_p2 = pneg %p1530_p13 }
  0x21   : > { %s1225_s9 = scalar_lea.hbm %s2175_s1, 256 }
  0x22   : > { %p1226_p0 = scmp.ne.s32.totalorder %s2175_s1, %s1225_s9  ;;  %p1232_p6 = scmp.lt.u32.totalorder %s1225_s9, %s2175_s1 }
  0x24   : > { %p1228_p4 = pnand %p1227_p2, %p1226_p0 }
  0x26   : > { %p1229_p5 = pneg %p1228_p4 }
  0x28   : > { %p1234_p8 = pnand %p1232_p6, %p1229_p5 }
  0x2a   : > { %1237 = shalt.err (!%p1234_p8)
}
  0x2b   : > { %s1238_s24 = scalar_lea.vmem %s169_s5, 256  ;;  %p1246_p7 = scmp.lt.s32.totalorder %s169_s5, %s169_s5 }
  0x2c   : > { %p1239_p10 = scmp.ne.s32.totalorder %s169_s5, %s1238_s24  ;;  %p1247_p1 = scmp.lt.s32.totalorder %s1238_s24, %s1238_s24 }
  0x2e   : > { %p1241_p12 = pnand %p1239_p10, %p1227_p2  ;;  %p1248_p3 = por %p1247_p1, %p1246_p7 }
  0x30   : > { %p1242_p9 = pneg %p1241_p12 }
  0x32   : > { %p1249_p11 = pnand %p1248_p3, %p1242_p9 }
  0x34   : > { %1252 = shalt.err (!%p1249_p11)
}
  0x35   : > { %s2158_s4 = smov 128   ;;  %s2159_s7 = smov 8  }
  0x36   : > { %1100 = dma.hbm_to_vmem [thread:$0]  (!%p1530_p13), %s2175_s1, 256, %s169_s5, [#allocation7], %s2158_s4, %s2158_s4, %s2159_s7  }
  0x37   : > { %s32_s10 = sadd.s32 1, %s1401_s20  ;;  %s39_s11 = sadd.s32 1, %s1405_s21 }
  0x38   : > { %p33_p1 = scmp.ge.s32.totalorder %s32_s10, 4  ;;  %s48_s15 = sadd.s32 1, %s1389_s17 }
  0x39   : > { %p55_p3 = scmp.ne.s32.totalorder %s1389_s17, %s1385_s16  ;;  %p56_p7 = scmp.eq.s32.totalorder %s1409_s22, 0 }
  0x3a   : > { %s2201_s10 = smov (%p33_p1, %s32_s10), 0  ;;  %s2203_s11 = smov (!%p33_p1, %s39_s11), %s1405_s21 }
  0x3b   : > { %2176 = sst [smem:[#allocation15_spill]] %s2201_s10  ;;  %s124_s6 = ssub.s32 %s1401_s20, %s2201_s10 }
  0x3c   : > { %p41_p9 = scmp.ge.s32.totalorder %s2203_s11, 2  ;;  %p1110_p11 = scmp.lt.s32.totalorder %s1409_s22, 8 }
  0x3d   : > { %p1565_p13 = por %p56_p7, %p55_p3  ;;  %s189_s23 = sand.u32 1, %s1389_s17  }
  0x3e   : > { %s2205_s11 = smov (%p41_p9, %s2203_s11), 0  ;;  %s1055_s24 = sshll.u32 %s189_s23, 8 }
  0x3f   : > { %2178 = sst [smem:[#allocation16_spill]] %s2205_s11  ;;  %s43_s8 = ssub.s32 %s1405_s21, %s2205_s11 }
  0x40   : > { %p46_p0 = scmp.eq.s32.totalorder %s43_s8, 0  ;;  %s125_s9 = sor.u32 %s124_s6, %s43_s8 }
  0x41   : > { %p128_p2 = scmp.eq.s32.totalorder %s125_s9, 0  ;;  %s1085_s4 = sshll.u32 %s1405_s21, 12 }
  0x42   : > { %s1576_s7 = scalar_select %p46_p0, %s1389_s17, %s48_s15  }
  0x43   : > { %s1581_s1 = scalar_select %p128_p2, %s1377_s14, %s130_s26  }
  0x44   : > { %s1586_s29 = scalar_lea.hbm %s2149_s0, %s1085_s4  ;;  %s193_s12 = scalar_lea.vmem [#allocation3], %s1055_s24 }
  0x45   : > { %s201_s11 = sshll.u32 %s193_s12, 4  ;;  %p1594_p4 = pnand %p1110_p11, %p1565_p13  ;;  %s1588_s11 = int_to_ptr.vmem [resolvable:$true] %s201_s11 }
  0x46   : > { %s1598_s26 = scalar_lea.sflag [#allocation4], %s189_s23  ;;  %s1253_s20 = scalar_lea.hbm %s1586_s29, 4096 }
  0x47   : > { %p1254_p5 = scmp.ne.s32.totalorder %s1586_s29, %s1253_s20  ;;  %p1255_p6 = pneg %p1594_p4 }
  0x48   : > { %s1258_s10 = scalar_lea.hbm %s2149_s0, 8192  ;;  %p1259_p12 = scmp.lt.u32.totalorder %s1586_s29, %s2149_s0 }
  0x49   : > { %p1256_p8 = pnand %p1255_p6, %p1254_p5  ;;  %p1260_p1 = scmp.lt.u32.totalorder %s1258_s10, %s1253_s20 }
  0x4a   : > { %p1262_p7 = scmp.lt.u32.totalorder %s1253_s20, %s1586_s29 }
  0x4b   : > { %p1257_p10 = pneg %p1256_p8  ;;  %p1261_p3 = por %p1260_p1, %p1259_p12 }
  0x4d   : > { %p1263_p9 = por %p1262_p7, %p1261_p3 }
  0x4f   : > { %p1264_p11 = pnand %p1263_p9, %p1257_p10 }
  0x51   : > { %1267 = shalt.err (!%p1264_p11)
}
  0x52   : > { %s1268_s23 = scalar_lea.vmem %s1588_s11, 4096  ;;  %s1414_s24 = smov [#allocation3]  }
  0x53   : > { %p1269_p13 = scmp.ne.s32.totalorder %s1588_s11, %s1268_s23  ;;  %s1273_s8 = sshll.u32 %s1414_s24, 4  ;;  %s1274_s8 = int_to_ptr.vmem [resolvable:$false] %s1273_s8 }
  0x54   : > { %s1275_s9 = scalar_lea.vmem %s1274_s8, 8192  ;;  %p1276_p5 = scmp.lt.s32.totalorder %s1588_s11, %s1274_s8 }
  0x55   : > { %p1271_p0 = pnand %p1269_p13, %p1255_p6  ;;  %p1277_p8 = scmp.lt.s32.totalorder %s1275_s9, %s1268_s23 }
  0x57   : > { %p1272_p2 = pneg %p1271_p0  ;;  %p1278_p12 = por %p1277_p8, %p1276_p5 }
  0x59   : > { %p1279_p1 = pnand %p1278_p12, %p1272_p2 }
  0x5b   : > { %1282 = shalt.err (!%p1279_p1)
}
  0x5c   : > { %s2180_s20 = smov 8   ;;  %s2181_s12 = smov 128  }
  0x5d   : > { %1104 = dma.hbm_to_vmem [thread:$0]  (!%p1594_p4), %s1586_s29, 4096, %s1588_s11, %s1598_s26, %s2181_s12, %s2181_s12, %s2180_s20  }
  0x5e   : > { %p2182_p6 = scmp.ne.s32.totalorder %s2173_s30, 0 }
  0x5f   : > { %s215_s4 = sand.u32 (!%p2182_p6), 1, %s1385_s16   ;;  %p2183_p10 = scmp.ne.s32.totalorder (!%p2182_p6), %s2169_s27, 0 }
  0x60   : > { %213 = sbr.rel (%p2182_p6) target bundleno = 289 (0x121), region = 32  ;;  %s1632_s10 = sshll.u32 (!%p2182_p6), %s215_s4, 8 }
  0x61   : > { %s216_s6 = scalar_lea.sflag (!%p2182_p6), [#allocation4], %s215_s4  ;;  %s219_s5 = scalar_lea.vmem (!%p2182_p6), [#allocation3], %s1632_s10 }
  0x67   : > { %1356 = dma.done.wait (%p2183_p10), %s216_s6, 4096  }
  0x68   : > { %1358 = vsyncadd (%p2183_p10), %s216_s6, 4294963200  ;;  %p2184_p3 = scmp.ne.s32.totalorder %s2168_s25, 0 }
  0x6a   : > { %1360 = dma.done.wait (%p2184_p3), [#allocation7], 256  }
  0x6b   : > { %1362 = vsyncadd (%p2184_p3), [#allocation7], 4294967040  ;;  %s247_s29 = sand.u32 1, %s1373_s13   ;;  %s1062_s30 = sshll.u32 %s1393_s18, 2  ;;  %v1415_v0 = vmov 0.0  }
  0x6c   : > { %s1647_s11 = sshll.u32 %s247_s29, 6  ;;  %256 = vst [vmem:[#allocation2] sm:$0x1] %v1415_v0  ;;  %257 = vst [vmem:[#allocation2 + $0x18] sm:$0x1] %v1415_v0  ;;  %s1086_s25 = sshll.u32 %s1393_s18, 6 }
  0x6d   : > { %258 = vst [vmem:[#allocation2 + $0x30] sm:$0x1] %v1415_v0  ;;  %259 = vst [vmem:[#allocation2 + $0x48] sm:$0x1] %v1415_v0  ;;  %s1652_s27 = scalar_lea.vmem %s219_s5, %s1086_s25 [#allocation3]  ;;  %s1663_s15 = scalar_lea.vmem [#allocation8], %s1647_s11 }
  0x6e   : > { %260 = vst [vmem:[#allocation2 + $0x60] sm:$0x1] %v1415_v0  ;;  %261 = vst [vmem:[#allocation2 + $0x78] sm:$0x1] %v1415_v0  ;;  %v270_v1 = vld [vmem:[%s1652_s27] sm:$0xff]  ;;  %v271_v2 = vld [vmem:[%s1652_s27 + $0x8] sm:$0xff] }
  0x6f   : > { %262 = vst [vmem:[#allocation2 + $0x11] sm:$0x7f] %v1415_v0  ;;  %263 = vst [vmem:[#allocation2 + $0x29] sm:$0x7f] %v1415_v0  ;;  %v272_v3 = vld [vmem:[%s1652_s27 + $0x10] sm:$0xff]  ;;  %v273_v4 = vld [vmem:[%s1652_s27 + $0x18] sm:$0xff] }
  0x70   : > { %264 = vst [vmem:[#allocation2 + $0x41] sm:$0x7f] %v1415_v0  ;;  %265 = vst [vmem:[#allocation2 + $0x59] sm:$0x7f] %v1415_v0  ;;  %v274_v5 = vld [vmem:[%s1652_s27 + $0x20] sm:$0xff]  ;;  %v275_v6 = vld [vmem:[%s1652_s27 + $0x28] sm:$0xff] }
  0x71   : > { %266 = vst [vmem:[#allocation2 + $0x71] sm:$0x7f] %v1415_v0  ;;  %267 = vst [vmem:[#allocation2 + $0x89] sm:$0x7f] %v1415_v0  ;;  %v276_v7 = vld [vmem:[%s1652_s27 + $0x30] sm:$0xff]  ;;  %v277_v8 = vld [vmem:[%s1652_s27 + $0x38] sm:$0xff] }
  0x72   : > { %279 = vst [vmem:[#allocation2 + $0x19] sm:$0xff] %v270_v1  ;;  %280 = vst [vmem:[#allocation2 + $0x21] sm:$0xff] %v271_v2  ;;  %p1064_p4 = scmp.ne.s32.totalorder %s1393_s18, 0 }
  0x73   : > { %281 = vst [vmem:[#allocation2 + $0x31] sm:$0xff] %v272_v3  ;;  %282 = vst [vmem:[#allocation2 + $0x39] sm:$0xff] %v273_v4  ;;  %v1416_v9 = vmov (!%p1064_p4), 0.0  }
  0x74   : > { %283 = vst [vmem:[#allocation2 + $0x49] sm:$0xff] %v274_v5  ;;  %284 = vst [vmem:[#allocation2 + $0x51] sm:$0xff] %v275_v6  ;;  %290 = sbr.rel (%p1064_p4) target bundleno = 123 (0x7b), region = 44 }
  0x75   : > { %285 = vst [vmem:[#allocation2 + $0x61] sm:$0xff] %v276_v7  ;;  %286 = vst [vmem:[#allocation2 + $0x69] sm:$0xff] %v277_v8 }
  0x76   : > { %291 = vst [vmem:[#allocation2 + $0x1] sm:$0xff] (!%p1064_p4), %v1416_v9  ;;  %292 = vst [vmem:[#allocation2 + $0x9] sm:$0xff] (!%p1064_p4), %v1416_v9 }
  0x7b PF: > { %p1065_p7 = scmp.le.s32.totalorder %s1393_s18, 0 }
  0x7c   : > { %s1066_s26 = sadd.s32 (!%p1065_p7), 4294967295, %s1062_s30 }
  0x7d   : > { %296 = sbr.rel (%p1065_p7) target bundleno = 132 (0x84), region = 48  ;;  %s1067_s23 = sshll.u32 (!%p1065_p7), %s1066_s26, 4 }
  0x7e   : > { %s299_s24 = scalar_lea.vmem (!%p1065_p7), %s219_s5, %s1067_s23 [#allocation3] }
  0x7f   : > { %v300_v10 = vld [vmem:[%s299_s24] sm:$0xff] (!%p1065_p7)  ;;  %v301_v11 = vld [vmem:[%s299_s24 + $0x8] sm:$0xff] (!%p1065_p7) }
  0x80   : > { %302 = vst [vmem:[#allocation2 + $0x1] sm:$0xff] (!%p1065_p7), %v300_v10  ;;  %303 = vst [vmem:[#allocation2 + $0x9] sm:$0xff] (!%p1065_p7), %v301_v11 }
  0x84 PF: > { %p1068_p9 = scmp.ne.s32.totalorder %s1393_s18, 3 }
  0x85   : > { %v1417_v12 = vmov (!%p1068_p9), 0.0  }
  0x86   : > { %307 = sbr.rel (%p1068_p9) target bundleno = 141 (0x8d), region = 52  ;;  %309 = vst [vmem:[#allocation2 + $0x79] sm:$0xff] (!%p1068_p9), %v1417_v12  ;;  %310 = vst [vmem:[#allocation2 + $0x81] sm:$0xff] (!%p1068_p9), %v1417_v12 }
  0x8d PF: > { %p1069_p11 = scmp.ge.s32.totalorder %s1393_s18, 3 }
  0x8e   : > { %v1072_v13 = vld [vmem:[%s1652_s27 + $0x40] sm:$0xff] (!%p1069_p11)  ;;  %v1073_v14 = vld [vmem:[%s1652_s27 + $0x48] sm:$0xff] (!%p1069_p11) }
  0x8f   : > { %314 = sbr.rel (%p1069_p11) target bundleno = 150 (0x96), region = 56  ;;  %321 = vst [vmem:[#allocation2 + $0x79] sm:$0xff] (!%p1069_p11), %v1072_v13  ;;  %322 = vst [vmem:[#allocation2 + $0x81] sm:$0xff] (!%p1069_p11), %v1073_v14 }
  0x96 PF: > { %v344_v15 = vlaneseq  ;;  %v323_v17 = vld [vmem:[#allocation6] sm:$0xff]  ;;  %vm392_vm0 = vcmask 1046528   ;;  %v332_v22 = vld [vmem:[#allocation2] sm:$0xff]  ;;  %v333_v23 = vld [vmem:[#allocation2 + $0x8] sm:$0xff]  ;;  %vm457_vm1 = vcmask 1045504   ;;  %s1088_s6 = sshll.u32 %s1393_s18, 3 }
  0x97   : > { %v1684_v31 = vld [vmem:[%s2151_s2] ss:$0 sm:$0xff]  ;;  %v1698_v40 = vld [vmem:[#allocation2 + $0x18] sm:$0xff]  ;;  %v1718_v55 = vld [vmem:[#allocation2 + $0x30] sm:$0xff]  ;;  %s1081_s5 = sshll.u32 %s1397_s19, 5  ;;  %s921_s11 = sshll.u32 %s1663_s15, 4  ;;  %s2078_s11 = int_to_ptr.vmem [resolvable:$true] %s921_s11 }
  0x98   : > { %v345_v16 = vshrl.u32 %v344_v15, 7  ;;  %v1700_v41 = vld [vmem:[#allocation2 + $0x20] sm:$0xff]  ;;  %v1712_v50 = vld [vmem:[#allocation6 + $0x8] ss:$0 sm:$0xff]  ;;  %v334_v60 = vld [vmem:[#allocation2 + $0x10] sm:$0xff]  ;;  %s918_s30 = sadd.s32 %s1088_s6, %s1081_s5  ;;  %s2088_s23 = scalar_lea.sflag [#allocation5], %s247_s29 }
  0x99   : > { %v1727_v0 = vld [vmem:[#allocation2 + $0x38] sm:$0xff]  ;;  %v755_v5 = vmul.f32 %v1712_v50, %v1718_v55  ;;  %s1082_s25 = sshll.u32 %s918_s30, 7  ;;  %s1283_s24 = scalar_lea.vmem %s2078_s11, 1024 }
  0x9a   : > { %v346_v18 = vsub.s32 0, %v345_v16  ;;  %v366_v19 = vsub.s32 1, %v345_v16  ;;  %v431_v20 = vsub.s32 2, %v345_v16  ;;  %v508_v21 = vsub.s32 3, %v345_v16  ;;  %s2083_s19 = scalar_lea.hbm %s2152_s3, %s1082_s25  ;;  %p1284_p13 = scmp.ne.s32.totalorder %s2078_s11, %s1283_s24 }
  0x9b   : > { %v528_v24 = vsub.s32 4, %v345_v16  ;;  %v592_v25 = vsub.s32 5, %v345_v16  ;;  %v669_v26 = vsub.s32 6, %v345_v16  ;;  %v689_v27 = vsub.s32 7, %v345_v16  ;;  %p2185_p0 = scmp.ne.s32.totalorder %s2170_s28, 0 }
  0x9c   : > { %v1675_v28 = vrot.slane %v323_v17, %v346_v18  ;;  %v1677_v29 = vrot.slane %v323_v17, %v366_v19  ;;  %v1679_v30 = vrot.slane %v323_v17, %v431_v20  ;;  %v1686_v32 = vrot.slane %v323_v17, %v508_v21  ;;  %v1742_v18 = vld [vmem:[#allocation2 + $0x28] sm:$0xff] }
  0x9d   : > { %v1688_v33 = vrot.slane %v323_v17, %v528_v24  ;;  %v1690_v34 = vrot.slane %v323_v17, %v592_v25  ;;  %v1692_v35 = vrot.slane %v323_v17, %v689_v27  ;;  %v1709_v45 = vrot.slane %v323_v17, %v669_v26  ;;  %p1285_p2 = pnand %p1284_p13, %p2185_p0 }
  0x9e   : > { %v348_v36 = vmul.f32 %v1675_v28, %v332_v22  ;;  %v368_v37 = vmul.f32 %v1677_v29, %v332_v22  ;;  %v369_v38 = vmul.f32 %v1677_v29, %v333_v23  ;;  %v433_v39 = vmul.f32 %v1679_v30, %v332_v22 }
  0x9f   : > { %v434_v42 = vmul.f32 %v1679_v30, %v333_v23  ;;  %v530_v43 = vmul.f32 %v1688_v33, %v1698_v40  ;;  %v1707_v44 = vmul.f32 %v1688_v33, %v1700_v41  ;;  %v510_v52 = vmul.f32 %v1686_v32, %v1698_v40  ;;  %p1286_p5 = pneg %p1285_p2 }
  0xa0   : > { %v356_v46 = vadd.f32 %v1684_v31, %v348_v36  ;;  %v393_v47 = vrot.slane %v368_v37, 1  ;;  %v394_v48 = vrot.slane %v369_v38, 1  ;;  %v458_v49 = vrot.slane %v433_v39, 2  ;;  %v1755_v39 = vld [vmem:[#allocation2 + $0x40] sm:$0xff] }
  0xa1   : > { %v459_v51 = vrot.slane %v434_v42, 2  ;;  %v554_v53 = vrot.slane %v530_v43, 1  ;;  %v594_v54 = vmul.f32 %v1690_v34, %v1698_v40  ;;  %v555_v57 = vrot.slane %v1707_v44, 1 }
  0xa2   : > { %v395_v56 = vsel %vm392_vm0, %v393_v47, %v394_v48  ;;  %v595_v58 = vmul.f32 %v1690_v34, %v1700_v41  ;;  %v691_v59 = vmul.f32 %v1692_v35, %v1718_v55  ;;  %v671_v1 = vmul.f32 %v1709_v45, %v1718_v55 }
  0xa3   : > { %v421_v61 = vadd.f32 %v395_v56, %v356_v46  ;;  %v460_v62 = vsel %vm457_vm1, %v458_v49, %v459_v51  ;;  %v618_v63 = vrot.slane %v594_v54, 2  ;;  %v692_v3 = vmul.f32 %v1692_v35, %v1727_v0 }
  0xa4   : > { %v619_v2 = vrot.slane %v595_v58, 2  ;;  %v715_v4 = vrot.slane %v691_v59, 1  ;;  %v756_v7 = vmul.f32 %v1712_v50, %v1727_v0  ;;  %v349_v8 = vmul.f32 %v1675_v28, %v333_v23 }
  0xa5   : > { %v486_v6 = vadd.f32 %v460_v62, %v421_v61  ;;  %v370_v9 = vmul.f32 %v1677_v29, %v334_v60  ;;  %v556_v10 = vsel %vm392_vm0, %v554_v53, %v555_v57  ;;  %v716_v11 = vrot.slane %v692_v3, 1 }
  0xa6   : > { %v779_v12 = vrot.slane %v755_v5, 2  ;;  %v435_v13 = vmul.f32 %v1679_v30, %v334_v60  ;;  %v780_v15 = vrot.slane %v756_v7, 2  ;;  %v357_v16 = vadd.f32 %v1684_v31, %v349_v8 }
  0xa7   : > { %v518_v14 = vadd.f32 %v510_v52, %v486_v6  ;;  %v396_v17 = vrot.slane %v370_v9, 1  ;;  %v620_v19 = vsel %vm457_vm1, %v618_v63, %v619_v2  ;;  %v717_v20 = vsel %vm392_vm0, %v715_v4, %v716_v11 }
  0xa8   : > { %v461_v21 = vrot.slane %v435_v13, 2  ;;  %v532_v22 = vmul.f32 %v1688_v33, %v1742_v18  ;;  %v511_v25 = vmul.f32 %v1686_v32, %v1700_v41  ;;  %v596_v26 = vmul.f32 %v1690_v34, %v1742_v18 }
  0xa9   : > { %v582_v23 = vadd.f32 %v556_v10, %v518_v14  ;;  %v397_v24 = vsel %vm392_vm0, %v394_v48, %v396_v17  ;;  %v781_v27 = vsel %vm457_vm1, %v779_v12, %v780_v15  ;;  %v693_v44 = vmul.f32 %v1692_v35, %v1755_v39 }
  0xaa   : > { %v422_v36 = vadd.f32 %v397_v24, %v357_v16  ;;  %v462_v37 = vsel %vm457_vm1, %v459_v51, %v461_v21  ;;  %v557_v38 = vrot.slane %v532_v22, 1  ;;  %v621_v43 = vrot.slane %v596_v26, 2  ;;  %v1799_v22 = vld [vmem:[#allocation2 + $0x48] sm:$0xff] }
  0xab   : > { %v646_v42 = vadd.f32 %v620_v19, %v582_v23  ;;  %v757_v46 = vmul.f32 %v1712_v50, %v1755_v39  ;;  %v672_v48 = vmul.f32 %v1709_v45, %v1727_v0  ;;  %v350_v49 = vmul.f32 %v1698_v40, %v1675_v28 }
  0xac   : > { %v487_v47 = vadd.f32 %v462_v37, %v422_v36  ;;  %v371_v51 = vmul.f32 %v1698_v40, %v1677_v29  ;;  %v558_v53 = vsel %vm392_vm0, %v555_v57, %v557_v38  ;;  %v718_v54 = vrot.slane %v693_v44, 1  ;;  %v1804_v37 = vld [vmem:[#allocation2 + $0x50] sm:$0xff] }
  0xad   : > { %v679_v52 = vadd.f32 %v671_v1, %v646_v42  ;;  %v782_v56 = vrot.slane %v757_v46, 2  ;;  %v622_v59 = vsel %vm457_vm1, %v619_v2, %v621_v43  ;;  %v1771_v60 = vmul.f32 %v1700_v41, %v1677_v29 }
  0xae   : > { %v519_v58 = vadd.f32 %v511_v25, %v487_v47  ;;  %v398_v61 = vrot.slane %v371_v51, 1  ;;  %v719_v63 = vsel %vm392_vm0, %v716_v11, %v718_v54  ;;  %v358_v3 = vadd.f32 %v1684_v31, %v350_v49 }
  0xaf   : > { %v743_v62 = vadd.f32 %v717_v20, %v679_v52  ;;  %v436_v1 = vmul.f32 %v1698_v40, %v1679_v30  ;;  %v783_v57 = vsel %vm457_vm1, %v780_v15, %v782_v56  ;;  %v399_v5 = vrot.slane %v1771_v60, 1 }
  0xb0   : > { %v583_v4 = vadd.f32 %v558_v53, %v519_v58  ;;  %v1781_v2 = vmul.f32 %v1700_v41, %v1679_v30  ;;  %v533_v8 = vmul.f32 %v1718_v55, %v1688_v33  ;;  %v1787_v9 = vmul.f32 %v1727_v0, %v1688_v33 }
  0xb1   : > { %v807_v6 = vadd.f32 %v781_v27, %v743_v62  ;;  %v463_v7 = vrot.slane %v436_v1, 2  ;;  %v400_v40 = vsel %vm392_vm0, %v398_v61, %v399_v5  ;;  %v597_v12 = vmul.f32 %v1718_v55, %v1690_v34 }
  0xb2   : > { %v647_v10 = vadd.f32 %v622_v59, %v583_v4  ;;  %v464_v11 = vrot.slane %v1781_v2, 2  ;;  %v423_v14 = vadd.f32 %v400_v40, %v358_v3  ;;  %v512_v15 = vmul.f32 %v1718_v55, %v1686_v32 }
  0xb3   : > { %v823_v13 = vmul.f32 0.70710677, %v807_v6  ;;  %v559_v16 = vrot.slane %v533_v8, 1  ;;  %v560_v20 = vrot.slane %v1787_v9, 1  ;;  %v598_v21 = vmul.f32 %v1727_v0, %v1690_v34  ;;  %v1832_v9 = vld [vmem:[#allocation2 + $0x58] sm:$0xff] }
  0xb4   : > { %v680_v17 = vadd.f32 %v672_v48, %v647_v10  ;;  %v465_v19 = vsel %vm457_vm1, %v463_v7, %v464_v11  ;;  %v623_v24 = vrot.slane %v597_v12, 2  ;;  %v673_v25 = vmul.f32 %v1709_v45, %v1799_v22 }
  0xb5   : > { %1209 = verf.f32 %v823_v13  ;;  %v488_v23 = vadd.f32 %v465_v19, %v423_v14  ;;  %v561_v27 = vsel %vm392_vm0, %v559_v16, %v560_v20  ;;  %v624_v36 = vrot.slane %v598_v21, 2 }
  0xb6   : > { %v744_v26 = vadd.f32 %v719_v63, %v680_v17  ;;  %v694_v38 = vmul.f32 %v1692_v35, %v1799_v22  ;;  %v695_v43 = vmul.f32 %v1692_v35, %v1804_v37  ;;  %v758_v44 = vmul.f32 %v1712_v50, %v1799_v22 }
  0xb7   : > { %v520_v42 = vadd.f32 %v512_v15, %v488_v23  ;;  %v759_v46 = vmul.f32 %v1712_v50, %v1804_v37  ;;  %v625_v48 = vsel %vm457_vm1, %v623_v24, %v624_v36  ;;  %v351_v51 = vmul.f32 %v1700_v41, %v1675_v28 }
  0xb8   : > { %v808_v47 = vadd.f32 %v783_v57, %v744_v26  ;;  %v720_v49 = vrot.slane %v694_v38, 1  ;;  %v721_v53 = vrot.slane %v695_v43, 1  ;;  %v784_v54 = vrot.slane %v758_v44, 2 }
  0xb9   : > { %v584_v52 = vadd.f32 %v561_v27, %v520_v42  ;;  %v785_v56 = vrot.slane %v759_v46, 2  ;;  %v815_v58 = vmul.f32 0.5, %v807_v6  ;;  %v373_v61 = vmul.f32 %v1742_v18, %v1677_v29  ;;  %v1857_v46 = vld [vmem:[%s2151_s2 + $0x2] ss:$0 sm:$0xff] }
  0xba   : > { %v1817_v59 = vmul.f32 0.5, %v808_v47  ;;  %v824_v60 = vmul.f32 0.70710677, %v808_v47  ;;  %v722_v63 = vsel %vm392_vm0, %v720_v49, %v721_v53  ;;  %v359_v3 = vadd.f32 %v1684_v31, %v351_v51 }
  0xbb   : > { %v648_v62 = vadd.f32 %v625_v48, %v584_v52  ;;  %v438_v1 = vmul.f32 %v1742_v18, %v1679_v30  ;;  %v786_v41 = vsel %vm457_vm1, %v784_v54, %v785_v56  ;;  %v401_v4 = vrot.slane %v373_v61, 1  ;;  %v879_v54 = vld [vmem:[%s1652_s27] sm:$0xff] }
  0xbc   : > { %1211 = verf.f32 %v824_v60  ;;  %v535_v57 = vmul.f32 %v1755_v39, %v1688_v33  ;;  %v513_v7 = vmul.f32 %v1727_v0, %v1686_v32  ;;  %v599_v8 = vmul.f32 %v1755_v39, %v1690_v34 }
  0xbd   : > { %v681_v2 = vadd.f32 %v673_v25, %v648_v62  ;;  %v466_v6 = vrot.slane %v438_v1, 2  ;;  %v402_v10 = vsel %vm392_vm0, %v399_v5, %v401_v4  ;;  %v696_v40 = vmul.f32 %v1692_v35, %v1832_v9  ;;  %v1845_v5 = vld [vmem:[%s2151_s2 + $0x1] ss:$0 sm:$0xff] }
  0xbe   : > { %v562_v18 = vrot.slane %v535_v57, 1  ;;  %v760_v12 = vmul.f32 %v1712_v50, %v1832_v9  ;;  %v424_v15 = vadd.f32 %v402_v10, %v359_v3  ;;  %v626_v17 = vrot.slane %v599_v8, 2 }
  0xbf   : > { %v1210_v13 = vpop.eup %1209  ;;  %v745_v14 = vadd.f32 %v722_v63, %v681_v2  ;;  %v467_v16 = vsel %vm457_vm1, %v464_v11, %v466_v6  ;;  %v674_v21 = vmul.f32 %v1709_v45, %v1804_v37  ;;  %v723_v23 = vrot.slane %v696_v40, 1 }
  0xc0   : > { %v839_v19 = vadd.f32 1.0, %v1210_v13  ;;  %v787_v24 = vrot.slane %v760_v12, 2  ;;  %v489_v26 = vadd.f32 %v467_v16, %v424_v15  ;;  %v563_v27 = vsel %vm392_vm0, %v560_v20, %v562_v18 }
  0xc1   : > { %v809_v25 = vadd.f32 %v786_v41, %v745_v14  ;;  %v352_v11 = vmul.f32 %v1718_v55, %v1675_v28  ;;  %v627_v42 = vsel %vm457_vm1, %v624_v36, %v626_v17  ;;  %v724_v43 = vsel %vm392_vm0, %v721_v53, %v723_v23  ;;  %v1899_v17 = vld [vmem:[#allocation2 + $0x60] sm:$0xff]  ;;  %v1902_v23 = vld [vmem:[#allocation2 + $0x68] sm:$0xff] }
  0xc2   : > { %v847_v38 = vmul.f32 %v839_v19, %v815_v58  ;;  %v374_v44 = vmul.f32 %v1718_v55, %v1677_v29  ;;  %v521_v48 = vadd.f32 %v513_v7, %v489_v26  ;;  %v788_v20 = vsel %vm457_vm1, %v785_v56, %v787_v24  ;;  %v880_v26 = vld [vmem:[%s1652_s27 + $0x8] sm:$0xff] }
  0xc3   : > { %v825_v47 = vmul.f32 0.70710677, %v809_v25  ;;  %v360_v49 = vadd.f32 %v1684_v31, %v352_v11  ;;  %v1864_v36 = vmul.f32 %v1727_v0, %v1677_v29  ;;  %v439_v53 = vmul.f32 %v1718_v55, %v1679_v30 }
  0xc4   : > { %v859_v51 = vmul.f32 %v1845_v5, %v847_v38  ;;  %v403_v52 = vrot.slane %v374_v44, 1  ;;  %v585_v58 = vadd.f32 %v563_v27, %v521_v48  ;;  %v1871_v60 = vmul.f32 %v1727_v0, %v1679_v30 }
  0xc5   : > { %1213 = verf.f32 %v825_v47  ;;  %v514_v56 = vmul.f32 %v1799_v22, %v1686_v32  ;;  %v404_v63 = vrot.slane %v1864_v36, 1  ;;  %v468_v3 = vrot.slane %v439_v53, 2 }
  0xc6   : > { %v1212_v61 = vpop.eup %1211  ;;  %v871_v62 = vadd.f32 %v1857_v46, %v859_v51  ;;  %v536_v55 = vmul.f32 %v1799_v22, %v1688_v33  ;;  %v649_v41 = vadd.f32 %v627_v42, %v585_v58  ;;  %v469_v4 = vrot.slane %v1871_v60, 2 }
  0xc7   : > { %v840_v1 = vadd.f32 1.0, %v1212_v61  ;;  %v1882_v57 = vmul.f32 %v1804_v37, %v1688_v33  ;;  %v405_v6 = vsel %vm392_vm0, %v403_v52, %v404_v63  ;;  %v600_v8 = vmul.f32 %v1799_v22, %v1690_v34 }
  0xc8   : > { %v887_v2 = vadd.f32 %v879_v54, %v871_v62  ;;  %v564_v7 = vrot.slane %v536_v55, 1  ;;  %v682_v18 = vadd.f32 %v674_v21, %v649_v41  ;;  %v425_v40 = vadd.f32 %v405_v6, %v360_v49 }
  0xc9   : > { %v848_v10 = vmul.f32 %v840_v1, %v1817_v59  ;;  %v470_v12 = vsel %vm457_vm1, %v468_v3, %v469_v4  ;;  %v817_v13 = vmul.f32 0.5, %v809_v25  ;;  %v565_v14 = vrot.slane %v1882_v57, 1 }
  0xca   : > { %895 = vst [vmem:[%s1663_s15] sm:$0xff] %v887_v2  ;;  %v1897_v15 = vmul.f32 %v1804_v37, %v1690_v34  ;;  %v628_v16 = vrot.slane %v600_v8, 2  ;;  %v746_v59 = vadd.f32 %v724_v43, %v682_v18  ;;  %v490_v21 = vadd.f32 %v470_v12, %v425_v40 }
  0xcb   : > { %v860_v19 = vmul.f32 %v1845_v5, %v848_v10  ;;  %v697_v24 = vmul.f32 %v1692_v35, %v1899_v17  ;;  %v566_v25 = vsel %vm392_vm0, %v564_v7, %v565_v14  ;;  %v698_v11 = vmul.f32 %v1692_v35, %v1902_v23 }
  0xcc   : > { %v629_v27 = vrot.slane %v1897_v15, 2  ;;  %v761_v38 = vmul.f32 %v1712_v50, %v1899_v17  ;;  %v810_v43 = vadd.f32 %v788_v20, %v746_v59  ;;  %v522_v44 = vadd.f32 %v514_v56, %v490_v21  ;;  %v1938_v15 = vld [vmem:[#allocation2 + $0x70] sm:$0xff] }
  0xcd   : > { %v872_v42 = vadd.f32 %v1857_v46, %v860_v19  ;;  %v725_v47 = vrot.slane %v697_v24, 1  ;;  %v726_v49 = vrot.slane %v698_v11, 1  ;;  %v1919_v51 = vmul.f32 %v1712_v50, %v1902_v23  ;;  %v881_v59 = vld [vmem:[%s1652_s27 + $0x10] sm:$0xff] }
  0xce   : > { %v630_v48 = vsel %vm457_vm1, %v628_v16, %v629_v27  ;;  %v789_v52 = vrot.slane %v761_v38, 2  ;;  %v826_v58 = vmul.f32 0.70710677, %v810_v43  ;;  %v586_v61 = vadd.f32 %v566_v25, %v522_v44 }
  0xcf   : > { %v1214_v53 = vpop.eup %1213  ;;  %v888_v54 = vadd.f32 %v880_v26, %v872_v42  ;;  %v675_v62 = vmul.f32 %v1709_v45, %v1899_v17  ;;  %v818_v20 = vmul.f32 0.5, %v810_v43  ;;  %v790_v56 = vrot.slane %v1919_v51, 2 }
  0xd0   : > { %v841_v3 = vadd.f32 1.0, %v1214_v53  ;;  %v353_v55 = vmul.f32 %v1727_v0, %v1675_v28  ;;  %1215 = verf.f32 %v826_v58  ;;  %v650_v1 = vadd.f32 %v630_v48, %v586_v61 }
  0xd1   : > { %896 = vst [vmem:[%s1663_s15 + $0x8] sm:$0xff] %v888_v54  ;;  %v376_v41 = vmul.f32 %v1755_v39, %v1677_v29  ;;  %v441_v2 = vmul.f32 %v1755_v39, %v1679_v30  ;;  %v727_v7 = vsel %vm392_vm0, %v725_v47, %v726_v49  ;;  %v791_v8 = vsel %vm457_vm1, %v789_v52, %v790_v56 }
  0xd2   : > { %v849_v6 = vmul.f32 %v841_v3, %v817_v13  ;;  %v361_v10 = vadd.f32 %v1684_v31, %v353_v55  ;;  %v683_v0 = vadd.f32 %v675_v62, %v650_v1  ;;  %v538_v12 = vmul.f32 %v1832_v9, %v1688_v33 }
  0xd3   : > { %v406_v18 = vrot.slane %v376_v41, 1  ;;  %v471_v40 = vrot.slane %v441_v2, 2  ;;  %v515_v39 = vmul.f32 %v1804_v37, %v1686_v32  ;;  %v602_v13 = vmul.f32 %v1832_v9, %v1690_v34 }
  0xd4   : > { %v861_v16 = vmul.f32 %v1845_v5, %v849_v6  ;;  %v699_v19 = vmul.f32 %v1692_v35, %v1938_v15  ;;  %v747_v21 = vadd.f32 %v727_v7, %v683_v0  ;;  %v567_v25 = vrot.slane %v538_v12, 1 }
  0xd5   : > { %v407_v24 = vsel %vm392_vm0, %v404_v63, %v406_v18  ;;  %v472_v26 = vsel %vm457_vm1, %v469_v4, %v471_v40  ;;  %v631_v42 = vrot.slane %v602_v13, 2  ;;  %v676_v47 = vmul.f32 %v1709_v45, %v1902_v23 }
  0xd6   : > { %v873_v11 = vadd.f32 %v1857_v46, %v861_v16  ;;  %v426_v38 = vadd.f32 %v407_v24, %v361_v10  ;;  %v728_v43 = vrot.slane %v699_v19, 1  ;;  %v811_v44 = vadd.f32 %v791_v8, %v747_v21  ;;  %v2001_v24 = vld [vmem:[#allocation2 + $0x80] sm:$0xff] }
  0xd7   : > { %v763_v36 = vmul.f32 %v1712_v50, %v1938_v15  ;;  %v354_v63 = vmul.f32 %v1799_v22, %v1675_v28  ;;  %v568_v4 = vsel %vm392_vm0, %v565_v14, %v567_v25  ;;  %v632_v52 = vsel %vm457_vm1, %v629_v27, %v631_v42 }
  0xd8   : > { %v889_v60 = vadd.f32 %v881_v59, %v873_v11  ;;  %v491_v48 = vadd.f32 %v472_v26, %v426_v38  ;;  %v1965_v53 = vmul.f32 0.5, %v811_v44  ;;  %v827_v54 = vmul.f32 0.70710677, %v811_v44 }
  0xd9   : > { %v729_v58 = vsel %vm392_vm0, %v726_v49, %v728_v43  ;;  %v792_v61 = vrot.slane %v763_v36, 2  ;;  %v377_v3 = vmul.f32 %v1799_v22, %v1677_v29  ;;  %v1973_v55 = vmul.f32 %v1804_v37, %v1677_v29 }
  0xda   : > { %897 = vst [vmem:[%s1663_s15 + $0x10] sm:$0xff] %v889_v60  ;;  %v523_v62 = vadd.f32 %v515_v39, %v491_v48  ;;  %v442_v57 = vmul.f32 %v1799_v22, %v1679_v30  ;;  %v1216_v14 = vpop.eup %1215  ;;  %1217 = verf.f32 %v827_v54  ;;  %v362_v27 = vadd.f32 %v1684_v31, %v354_v63  ;;  %v664_v39 = vld [vmem:[#allocation2 + $0x78] sm:$0xff] }
  0xdb   : > { %v1980_v49 = vmul.f32 %v1804_v37, %v1679_v30  ;;  %v516_v1 = vmul.f32 %v1899_v17, %v1686_v32  ;;  %v842_v41 = vadd.f32 1.0, %v1216_v14  ;;  %v408_v6 = vrot.slane %v377_v3, 1 }
  0xdc   : > { %v587_v2 = vadd.f32 %v568_v4, %v523_v62  ;;  %v409_v7 = vrot.slane %v1973_v55, 1  ;;  %v473_v8 = vrot.slane %v442_v57, 2  ;;  %v539_v22 = vmul.f32 %v1899_v17, %v1688_v33 }
  0xdd   : > { %v474_v10 = vrot.slane %v1980_v49, 2  ;;  %v1990_v0 = vmul.f32 %v1902_v23, %v1688_v33  ;;  %v850_v18 = vmul.f32 %v842_v41, %v818_v20  ;;  %v603_v16 = vmul.f32 %v1899_v17, %v1690_v34  ;;  %v882_v17 = vld [vmem:[%s1652_s27 + $0x18] sm:$0xff] }
  0xde   : > { %v651_v40 = vadd.f32 %v632_v52, %v587_v2  ;;  %v410_v12 = vsel %vm392_vm0, %v408_v6, %v409_v7  ;;  %v569_v59 = vrot.slane %v539_v22, 1  ;;  %v2006_v25 = vmul.f32 %v1902_v23, %v1690_v34 }
  0xdf   : > { %v427_v13 = vadd.f32 %v410_v12, %v362_v27  ;;  %v475_v19 = vsel %vm457_vm1, %v473_v8, %v474_v10  ;;  %v570_v21 = vrot.slane %v1990_v0, 1  ;;  %v862_v20 = vmul.f32 %v1845_v5, %v850_v18 }
  0xe0   : > { %v684_v26 = vadd.f32 %v676_v47, %v651_v40  ;;  %v633_v11 = vrot.slane %v603_v16, 2  ;;  %v793_v38 = vsel %vm457_vm1, %v790_v56, %v792_v61  ;;  %v700_v44 = vmul.f32 %v1692_v35, %v664_v39 }
  0xe1   : > { %v492_v42 = vadd.f32 %v475_v19, %v427_v13  ;;  %v571_v43 = vsel %vm392_vm0, %v569_v59, %v570_v21  ;;  %v874_v36 = vadd.f32 %v1857_v46, %v862_v20  ;;  %v634_v47 = vrot.slane %v2006_v25, 2  ;;  %v883_v19 = vld [vmem:[%s1652_s27 + $0x20] sm:$0xff] }
  0xe2   : > { %v748_v63 = vadd.f32 %v729_v58, %v684_v26  ;;  %v2018_v60 = vmul.f32 %v1692_v35, %v2001_v24  ;;  %v730_v4 = vrot.slane %v700_v44, 1  ;;  %v764_v51 = vmul.f32 %v1712_v50, %v664_v39 }
  0xe3   : > { %v524_v48 = vadd.f32 %v516_v1, %v492_v42  ;;  %v2023_v56 = vmul.f32 %v1712_v50, %v2001_v24  ;;  %v890_v52 = vadd.f32 %v882_v17, %v874_v36  ;;  %v635_v61 = vsel %vm457_vm1, %v633_v11, %v634_v47 }
  0xe4   : > { %v812_v54 = vadd.f32 %v793_v38, %v748_v63  ;;  %v731_v58 = vrot.slane %v2018_v60, 1  ;;  %v1218_v62 = vpop.eup %1217  ;;  %v677_v57 = vmul.f32 %v1709_v45, %v664_v39  ;;  %v355_v14 = vmul.f32 %v1804_v37, %v1675_v28 }
  0xe5   : > { %v588_v3 = vadd.f32 %v571_v43, %v524_v48  ;;  %898 = vst [vmem:[%s1663_s15 + $0x18] sm:$0xff] %v890_v52  ;;  %v843_v27 = vadd.f32 1.0, %v1218_v62  ;;  %v794_v41 = vrot.slane %v764_v51, 2  ;;  %v795_v2 = vrot.slane %v2023_v56, 2 }
  0xe6   : > { %v828_v1 = vmul.f32 0.70710677, %v812_v54  ;;  %v732_v8 = vsel %vm392_vm0, %v730_v4, %v731_v58  ;;  %v379_v22 = vmul.f32 %v1832_v9, %v1677_v29  ;;  %v363_v18 = vadd.f32 %v1684_v31, %v355_v14 }
  0xe7   : > { %v652_v6 = vadd.f32 %v635_v61, %v588_v3  ;;  %v851_v0 = vmul.f32 %v843_v27, %v1965_v53  ;;  %v444_v28 = vmul.f32 %v1832_v9, %v1679_v30  ;;  %v541_v12 = vmul.f32 %v1938_v15, %v1688_v33  ;;  %v666_v53 = vld [vmem:[#allocation2 + $0x88] sm:$0xff] }
  0xe8   : > { %1219 = verf.f32 %v828_v1  ;;  %v411_v40 = vrot.slane %v379_v22, 1  ;;  %v605_v16 = vmul.f32 %v1938_v15, %v1690_v34  ;;  %v796_v29 = vsel %vm457_vm1, %v794_v41, %v795_v2  ;;  %v886_v22 = vld [vmem:[%s1652_s27 + $0x38] sm:$0xff] }
  0xe9   : > { %v685_v37 = vadd.f32 %v677_v57, %v652_v6  ;;  %v863_v39 = vmul.f32 %v1845_v5, %v851_v0  ;;  %v476_v13 = vrot.slane %v444_v28, 2  ;;  %v572_v9 = vrot.slane %v541_v12, 1  ;;  %v885_v57 = vld [vmem:[%s1652_s27 + $0x30] sm:$0xff] }
  0xea   : > { %v412_v30 = vsel %vm392_vm0, %v409_v7, %v411_v40  ;;  %v517_v15 = vmul.f32 %v1902_v23, %v1686_v32  ;;  %v636_v26 = vrot.slane %v605_v16, 2  ;;  %v702_v25 = vmul.f32 %v1692_v35, %v666_v53 }
  0xeb   : > { %v749_v31 = vadd.f32 %v732_v8, %v685_v37  ;;  %v875_v59 = vadd.f32 %v1857_v46, %v863_v39  ;;  %v428_v33 = vadd.f32 %v412_v30, %v363_v18  ;;  %v477_v34 = vsel %vm457_vm1, %v474_v10, %v476_v13 }
  0xec   : > { %v573_v7 = vsel %vm392_vm0, %v570_v21, %v572_v9  ;;  %v766_v38 = vmul.f32 %v1712_v50, %v666_v53  ;;  %v820_v49 = vmul.f32 0.5, %v812_v54  ;;  %v637_v10 = vsel %vm457_vm1, %v634_v47, %v636_v26  ;;  %v884_v47 = vld [vmem:[%s1652_s27 + $0x28] sm:$0xff]  ;;  %s1418_s27 = smov [#allocation8]  }
  0xed   : > { %v813_v20 = vadd.f32 %v796_v29, %v749_v31  ;;  %v891_v11 = vadd.f32 %v883_v19, %v875_v59  ;;  %v493_v17 = vadd.f32 %v477_v34, %v428_v33  ;;  %v733_v43 = vrot.slane %v702_v25, 1  ;;  %s1287_s8 = sshll.u32 %s1418_s27, 4  ;;  %s1288_s8 = int_to_ptr.vmem [resolvable:$false] %s1287_s8 }
  0xee   : > { %v678_v35 = vmul.f32 %v1709_v45, %v2001_v24  ;;  %v797_v36 = vrot.slane %v766_v38, 2  ;;  %s1289_s9 = scalar_lea.vmem %s1288_s8, 2048  ;;  %p1290_p8 = scmp.lt.s32.totalorder %s2078_s11, %s1288_s8 }
  0xef   : > { %v829_v55 = vmul.f32 0.70710677, %v813_v20  ;;  %899 = vst [vmem:[%s1663_s15 + $0x20] sm:$0xff] %v891_v11  ;;  %v525_v42 = vadd.f32 %v517_v15, %v493_v17  ;;  %v734_v50 = vsel %vm392_vm0, %v731_v58, %v733_v43  ;;  %v821_v52 = vmul.f32 0.5, %v813_v20  ;;  %p1291_p12 = scmp.lt.s32.totalorder %s1289_s9, %s1283_s24 }
  0xf0   : > { %v798_v4 = vsel %vm457_vm1, %v795_v2, %v797_v36 }
  0xf1   : > { %1221 = verf.f32 %v829_v55  ;;  %v589_v23 = vadd.f32 %v573_v7, %v525_v42  ;;  %p1292_p1 = por %p1291_p12, %p1290_p8 }
  0xf2   : > { %v1220_v32 = vpop.eup %1219 }
  0xf3   : > { %v844_v44 = vadd.f32 1.0, %v1220_v32  ;;  %v653_v63 = vadd.f32 %v637_v10, %v589_v23  ;;  %p1293_p6 = pnand %p1292_p1, %p1286_p5 }
  0xf5   : > { %v852_v21 = vmul.f32 %v844_v44, %v820_v49  ;;  %v686_v60 = vadd.f32 %v678_v35, %v653_v63 }
  0xf7   : > { %v864_v48 = vmul.f32 %v1845_v5, %v852_v21  ;;  %v750_v51 = vadd.f32 %v734_v50, %v686_v60 }
  0xf9   : > { %v876_v56 = vadd.f32 %v1857_v46, %v864_v48  ;;  %v814_v45 = vadd.f32 %v798_v4, %v750_v51 }
  0xfb   : > { %v1222_v24 = vpop.eup %1221  ;;  %v892_v54 = vadd.f32 %v884_v47, %v876_v56  ;;  %v830_v62 = vmul.f32 0.70710677, %v814_v45  ;;  %v822_v1 = vmul.f32 0.5, %v814_v45 }
  0xfc   : > { %v845_v61 = vadd.f32 1.0, %v1222_v24 }
  0xfd   : > { %900 = vst [vmem:[%s1663_s15 + $0x28] sm:$0xff] %v892_v54  ;;  %1223 = verf.f32 %v830_v62 }
  0xfe   : > { %v853_v58 = vmul.f32 %v845_v61, %v821_v52 }
 0x100   : > { %v865_v3 = vmul.f32 %v1845_v5, %v853_v58 }
 0x102   : > { %v877_v14 = vadd.f32 %v1857_v46, %v865_v3 }
 0x104   : > { %v893_v27 = vadd.f32 %v885_v57, %v877_v14 }
 0x106   : > { %901 = vst [vmem:[%s1663_s15 + $0x30] sm:$0xff] %v893_v27 }
 0x107   : > { %v1224_v41 = vpop.eup %1223 }
 0x108   : > { %v846_v2 = vadd.f32 1.0, %v1224_v41 }
 0x10a   : > { %v854_v6 = vmul.f32 %v846_v2, %v822_v1 }
 0x10c   : > { %v866_v8 = vmul.f32 %v1845_v5, %v854_v6 }
 0x10e   : > { %v878_v0 = vadd.f32 %v1857_v46, %v866_v8 }
 0x110   : > { %v894_v18 = vadd.f32 %v886_v22, %v878_v0 }
 0x112   : > { %902 = vst [vmem:[%s1663_s15 + $0x38] sm:$0xff] %v894_v18 }
 0x113   : > { %1296 = shalt.err (!%p1293_p6)
}
 0x114   : > { %s1297_s29 = scalar_lea.hbm %s2083_s19, 1024  ;;  %s1301_s12 = scalar_lea.hbm %s2152_s3, 8192 }
 0x115   : > { %p1298_p10 = scmp.ne.s32.totalorder %s2083_s19, %s1297_s29  ;;  %p1302_p7 = scmp.lt.u32.totalorder %s2083_s19, %s2152_s3 }
 0x116   : > { %p1303_p9 = scmp.lt.u32.totalorder %s1301_s12, %s1297_s29  ;;  %p1305_p13 = scmp.lt.u32.totalorder %s1297_s29, %s2083_s19 }
 0x117   : > { %p1299_p3 = pnand %p1298_p10, %p2185_p0 }
 0x118   : > { %p1304_p11 = por %p1303_p9, %p1302_p7 }
 0x119   : > { %p1300_p4 = pneg %p1299_p3 }
 0x11a   : > { %p1306_p2 = por %p1305_p13, %p1304_p11 }
 0x11c   : > { %p1307_p5 = pnand %p1306_p2, %p1300_p4 }
 0x11e   : > { %1310 = shalt.err (!%p1307_p5)
}
 0x11f   : > { %s1419_s6 = smov 128   ;;  %s1420_s5 = smov 8  }
 0x120   : > { %1095 = dma.vmem_to_hbm [thread:$0]  (%p2185_p0), %s2078_s11, 1024, %s2083_s19, %s2088_s23, %s1419_s6, %s1419_s6, %s1420_s5  }
 0x121 PF: > { %s2186_s30 = sld [smem:[#allocation12_spill]]  ;;  %s2187_s25 = sld [smem:[#allocation14_spill]] }
 0x122   : > { %p1112_p8 = scmp.ge.s32.totalorder %s1409_s22, 2 }
 0x127   : > { %s936_s26 = sand.u32 1, %s2186_s30   ;;  %p2188_p12 = scmp.ne.s32.totalorder %s2187_s25, 0 }
 0x128   : > { %s937_s18 = scalar_lea.sflag [#allocation5], %s936_s26 }
 0x129   : > { %p1106_p1 = pnand %p1112_p8, %p2188_p12 }
 0x12b   : > { %1364 = dma.done.wait (!%p1106_p1), %s937_s18, 1024  }
 0x12c   : > { %1366 = vsyncadd (!%p1106_p1), %s937_s18, 4294966272  ;;  %s20_s22 = sadd.s32 1, %s1409_s22   ;;  %s2189_s18 = sld [smem:[#allocation13_spill]] }
 0x12d   : > { %p17_p6 = scmp.ge.s32.totalorder %s20_s22, 10   ;;  %s2190_s20 = sld [smem:[#allocation15_spill]] }
 0x12e   : > { %s2191_s28 = sld [smem:[#allocation16_spill]]  ;;  %s2192_s12 = smov %s1373_s13 }
 0x12f   : > { %s2193_s13 = smov %s1377_s14  ;;  %s2194_s14 = smov %s1581_s1 }
 0x130   : > { %s2195_s15 = smov %s1385_s16  ;;  %s2196_s16 = smov %s1389_s17 }
 0x131   : > { %s2197_s17 = smov %s1576_s7  ;;  %s2198_s19 = smov %s1405_s21 }
 0x132   :  { %19 = sbr.rel (!%p17_p6) target bundleno = 12 (0xc), region = 108 }
 0x134   : > { %s2199_s21 = smov %s2191_s28 }
 0x139   :  { %942 = vsyncpa [#allocation4], 1 }
 0x13a   :  { %944 = vsyncpa [#allocation4 + $0x1], 1 }
 0x13b   :  { %945 = vsyncpa [#allocation7], 1 }
 0x13c   :  { %946 = vsyncpa [#allocation5], 1 }
 0x13d   :  { %948 = vsyncpa [#allocation5 + $0x1], 1 }

</bundles_post_ra>
